<compile_context>
chip_gen: v6e
topology: v6e:2x2x1
jax: 0.10.0
libtpu: 0.0.40
codegen_flags: <defaults>
</compile_context>

<pallas_src>
import jax
import jax.numpy as jnp
from jax.experimental import pallas as pl
from jax.experimental.pallas import tpu as pltpu


def _sigmoid(z):
    # Exact identity: sigmoid(z) == 0.5 * tanh(0.5 * z) + 0.5.
    # Single EUP transcendental; the mul/adds ride the VPU slots.
    return 0.5 * jnp.tanh(0.5 * z) + 0.5


def _mlp_kernel(x_ref, w1t_ref, w2t_ref, o_ref):
    # x_ref:   (tb, input)
    # w1t_ref: (input, hidden)   -- pre-transposed in the wrapper
    # w2t_ref: (hidden, out_pad) -- pre-transposed (+ lane-padded) in the wrapper
    h = jnp.dot(x_ref[...], w1t_ref[...], preferred_element_type=jnp.float32)
    h = _sigmoid(h)
    y = jnp.dot(h, w2t_ref[...], preferred_element_type=jnp.float32)
    o_ref[...] = _sigmoid(y).astype(o_ref.dtype)


def _weight_spec(shape, single_buffer):
    # Constant block index across the grid -> single buffer is enough.
    if single_buffer:
        return pl.BlockSpec(shape, lambda i: (0, 0), pipeline_mode=pl.Buffered(1))
    return pl.BlockSpec(shape, lambda i: (0, 0))


def mlp_forward(x, w1, w2, *, batch_block=512):
    """Pallas TPU forward pass equivalent to Net.forward(x, w1, w2)."""
    batch, input_size = x.shape
    hidden_size, in_chk = w1.shape
    output_size, hid_chk = w2.shape
    assert in_chk == input_size and hid_chk == hidden_size

    # One-time HLO transposes outside the kernel (amortized over all grid steps).
    w1t = jnp.transpose(w1)  # (input, hidden)
    w2t = jnp.transpose(w2)  # (hidden, output)

    if batch <= batch_block:
        # Small problem: single shot, whole arrays VMEM-resident, no grid /
        # pipeline machinery (which would dominate at toy sizes).
        return pl.pallas_call(
            _mlp_kernel,
            out_shape=jax.ShapeDtypeStruct((batch, output_size), jnp.float32),
            in_specs=[pl.BlockSpec(memory_space=pltpu.MemorySpace.VMEM)] * 3,
            out_specs=pl.BlockSpec(memory_space=pltpu.MemorySpace.VMEM),
        )(x, w1t, w2t)

    # ----- Tiled, pipelined path (batch > batch_block) -----
    assert batch_block % 8 == 0, "batch_block must be a multiple of 8 (sublanes)"

    # Pad batch so every large batch stays on the tiled path; grid >= 2 steps.
    n_blocks = pl.cdiv(batch, batch_block)
    padded_batch = n_blocks * batch_block
    x_p = jnp.pad(x, ((0, padded_batch - batch), (0, 0))) if padded_batch != batch else x

    # Lane-pad the output dim to a multiple of 128 for unmasked vst stores.
    out_pad = pl.cdiv(output_size, 128) * 128
    w2t_p = jnp.pad(w2t, ((0, 0), (0, out_pad - output_size))) if out_pad != output_size else w2t

    def _tiled_call(single_buffer_weights):
        return pl.pallas_call(
            _mlp_kernel,
            out_shape=jax.ShapeDtypeStruct((padded_batch, out_pad), jnp.float32),
            grid=(n_blocks,),
            in_specs=[
                pl.BlockSpec((batch_block, input_size), lambda i: (i, 0)),
                _weight_spec((input_size, hidden_size), single_buffer_weights),
                _weight_spec((hidden_size, out_pad), single_buffer_weights),
            ],
            out_specs=pl.BlockSpec((batch_block, out_pad), lambda i: (i, 0)),
            compiler_params=pltpu.CompilerParams(
                dimension_semantics=("parallel",),
            ),
        )(x_p, w1t, w2t_p)

    try:
        out = _tiled_call(True)
    except Exception:
        # Fallback for JAX builds where pipeline_mode=pl.Buffered(1) is unsupported.
        out = _tiled_call(False)

    return out[:batch, :output_size]


def _reference(x, w1, w2):
    h = jax.nn.sigmoid(x @ w1.T)
    return jax.nn.sigmoid(h @ w2.T)


if __name__ == "__main__":
    # Shapes consistent with the module: batch=8, input=32, hidden=32, out=16.
    batch, input_size, hidden_size, output_size = 8, 32, 32, 16

    key = jax.random.PRNGKey(0)
    kx, k1, k2, kb = jax.random.split(key, 4)
    x = jax.random.normal(kx, (batch, input_size), dtype=jnp.float32)
    w1 = jax.random.normal(k1, (hidden_size, input_size), dtype=jnp.float32) * 0.1
    w2 = jax.random.normal(k2, (output_size, hidden_size), dtype=jnp.float32) * 0.1

    out = mlp_forward(x, w1, w2)
    jax.block_until_ready(out)
    ref = _reference(x, w1, w2)
    assert out.shape == (batch, output_size)
    assert jnp.allclose(out, ref, atol=1e-5, rtol=1e-5), "mismatch vs reference (small)"

    # Exercise the tiled path: non-multiple batch (padding), lane-padded output,
    # pinned single-buffered weights, >=2-step 'parallel' grid.
    big_batch = 300
    xb = jax.random.normal(kb, (big_batch, input_size), dtype=jnp.float32)
    outb = mlp_forward(xb, w1, w2, batch_block=128)
    jax.block_until_ready(outb)
    refb = _reference(xb, w1, w2)
    assert outb.shape == (big_batch, output_size)
    assert jnp.allclose(outb, refb, atol=1e-5, rtol=1e-5), "mismatch vs reference (tiled)"

    print("KERNEL_OK")
</pallas_src>

<mosaic_0001>
module attributes {stable_mosaic.version = 11 : i64} {
  func.func @_mlp_kernel(%arg0: memref<8x32xf32, #tpu.memory_space<vmem>>, %arg1: memref<32x32xf32, #tpu.memory_space<vmem>>, %arg2: memref<32x16xf32, #tpu.memory_space<vmem>>, %arg3: memref<8x16xf32, #tpu.memory_space<vmem>>) attributes {dimension_semantics = [], scalar_prefetch = 0 : i64, scratch_operands = 0 : i64, tpu.core_type = #tpu.core_type<tc>} {
    %c0 = arith.constant 0 : index
    %c0_0 = arith.constant 0 : index
    %0 = vector.load %arg0[%c0, %c0_0] : memref<8x32xf32, #tpu.memory_space<vmem>>, vector<8x32xf32>
    %c0_1 = arith.constant 0 : index
    %c0_2 = arith.constant 0 : index
    %1 = vector.load %arg1[%c0_1, %c0_2] : memref<32x32xf32, #tpu.memory_space<vmem>>, vector<32x32xf32>
    %cst = arith.constant dense<0.000000e+00> : vector<8x32xf32>
    %2 = tpu.matmul %0, %1, %cst {dimension_numbers = #tpu.dot_dimension_numbers<[1], [0], [0], [1], [0, 0, 1, 1], [], []>} : vector<8x32xf32>, vector<32x32xf32>, vector<8x32xf32> -> vector<8x32xf32>
    %cst_3 = arith.constant 5.000000e-01 : f32
    %3 = vector.broadcast %cst_3 : f32 to vector<8x32xf32>
    %4 = arith.mulf %3, %2 : vector<8x32xf32>
    %5 = math.tanh %4 : vector<8x32xf32>
    %cst_4 = arith.constant 5.000000e-01 : f32
    %6 = vector.broadcast %cst_4 : f32 to vector<8x32xf32>
    %7 = arith.mulf %6, %5 : vector<8x32xf32>
    %cst_5 = arith.constant 5.000000e-01 : f32
    %8 = vector.broadcast %cst_5 : f32 to vector<8x32xf32>
    %9 = arith.addf %7, %8 : vector<8x32xf32>
    %c0_6 = arith.constant 0 : index
    %c0_7 = arith.constant 0 : index
    %10 = vector.load %arg2[%c0_6, %c0_7] : memref<32x16xf32, #tpu.memory_space<vmem>>, vector<32x16xf32>
    %cst_8 = arith.constant dense<0.000000e+00> : vector<8x16xf32>
    %11 = tpu.matmul %9, %10, %cst_8 {dimension_numbers = #tpu.dot_dimension_numbers<[1], [0], [0], [1], [0, 0, 1, 1], [], []>} : vector<8x32xf32>, vector<32x16xf32>, vector<8x16xf32> -> vector<8x16xf32>
    %cst_9 = arith.constant 5.000000e-01 : f32
    %12 = vector.broadcast %cst_9 : f32 to vector<8x16xf32>
    %13 = arith.mulf %12, %11 : vector<8x16xf32>
    %14 = math.tanh %13 : vector<8x16xf32>
    %cst_10 = arith.constant 5.000000e-01 : f32
    %15 = vector.broadcast %cst_10 : f32 to vector<8x16xf32>
    %16 = arith.mulf %15, %14 : vector<8x16xf32>
    %cst_11 = arith.constant 5.000000e-01 : f32
    %17 = vector.broadcast %cst_11 : f32 to vector<8x16xf32>
    %18 = arith.addf %16, %17 : vector<8x16xf32>
    %c0_12 = arith.constant 0 : index
    %c0_13 = arith.constant 0 : index
    %19 = vector.load %arg3[%c0_12, %c0_13] : memref<8x16xf32, #tpu.memory_space<vmem>>, vector<8x16xf32>
    tpu.vector_store %arg3[%c0_12, %c0_13], %18 {strides = array<i32>} : memref<8x16xf32, #tpu.memory_space<vmem>>, vector<8x16xf32>,
    return
  }
}

</mosaic_0001>

<bundles_post_ra>
// kernel: tpu_custom_call.1
= control target key start
LH: loop header
LB: loop body
LE: loop exit
PB: predicated region body
PF: predicated region fallthrough
CT: control target
= control target key end

     0   :  { %v258_v1 = vmov 0.0   ;;  %vm259_vm0 = vmmov 0   ;;  %s313_s0 = inlined_call_operand.vmem [shape: f32[8,32], index: 0, kind: input, shape index: {}]   ;;  %s314_s1 = inlined_call_operand.vmem [shape: f32[32,32], index: 1, kind: input, shape index: {}]   ;;  %s315_s2 = inlined_call_operand.vmem [shape: f32[32,16], index: 2, kind: input, shape index: {}]   ;;  %s316_s3 = inlined_call_operand.hbm [shape: f32[8,16], index: 3, kind: output, shape index: {}]  }
   0x1   :  { %v19_v0 = vld [vmem:[%s314_s1 + $0x18] sm:$0xff]  ;;  %207 = vmatprep.subr.mxu0 %v258_v1  ;;  %v18_v2 = vld [vmem:[%s314_s1 + $0x10] sm:$0xff]  ;;  %215 = vmatprep.mubr.msk.f32.mxu0 %vm259_vm0, %v258_v1 }
   0x2   :  { %8 = vsyncpa [#allocation3], 0  ;;  %208 = vmatpush3.msra.mxu0 %v19_v0  ;;  %218 = vmatprep.subr.mxu1 %v258_v1  ;;  %v17_v3 = vld [vmem:[%s314_s1 + $0x8] sm:$0xff]  ;;  %v16_v4 = vld [vmem:[%s314_s1] sm:$0xff]  ;;  %vm20_vm1 = vcmask 261120   ;;  %s260_s28 = smov [#allocation2]  }
   0x3   :  { %209 = vmatprep.subr.mxu0 %v258_v1  ;;  %226 = vmatprep.mubr.msk.f32.mxu1 %vm259_vm0, %v258_v1  ;;  %v15_v5 = vld [vmem:[%s313_s0] sm:$0xff]  ;;  %v101_v6 = vld [vmem:[%s315_s2 + $0x18] sm:$0xff]  ;;  %v100_v7 = vld [vmem:[%s315_s2 + $0x10] sm:$0xff]  ;;  %s187_s29 = sshll.u32 %s260_s28, 4  ;;  %vm179_vm2 = vcmask 130048   ;;  %s188_s29 = int_to_ptr.vmem [resolvable:$true] %s187_s29 }
   0x4   :  { %210 = vmatpush3.msra.mxu0 %v18_v2  ;;  %219 = vmatpush3.msra.mxu1 %v101_v6  ;;  %v99_v8 = vld [vmem:[%s315_s2 + $0x8] sm:$0xff]  ;;  %v98_v9 = vld [vmem:[%s315_s2] sm:$0xff]  ;;  %s236_s2 = scalar_lea.vmem %s188_s29, 128  ;;  %p241_p1 = scmp.lt.s32.totalorder %s188_s29, %s188_s29 }
   0x5   :  { %211 = vmatprep.subr.mxu0 %v258_v1  ;;  %220 = vmatprep.subr.mxu1 %v258_v1  ;;  %p237_p0 = scmp.ne.s32.totalorder %s188_s29, %s236_s2  ;;  %p242_p2 = scmp.lt.s32.totalorder %s236_s2, %s236_s2 }
   0x6   :  { %212 = vmatpush3.msra.mxu0 %v17_v3  ;;  %221 = vmatpush3.msra.mxu1 %v100_v7 }
   0x7   :  { %213 = vmatprep.subr.mxu0 %v258_v1  ;;  %222 = vmatprep.subr.mxu1 %v258_v1  ;;  %p243_p3 = por %p242_p2, %p241_p1 }
   0x8   :  { %214 = vmatpush3.msra.mxu0 %v16_v4  ;;  %223 = vmatpush3.msra.mxu1 %v99_v8 }
   0x9   :  { %216 = vmatmul.mubr.msk.f32.vlgmr.msra.gmra.mxu0 %vm20_vm1, %v15_v5  ;;  %224 = vmatprep.subr.mxu1 %v258_v1  ;;  %p244_p4 = pnand %p243_p3, %p237_p0 }
   0xa   :  { %225 = vmatpush3.msra.mxu1 %v98_v9 }
  0xc9   :  { %v90_v10 = vpop.f32.mrf.mxu0 }
  0xca   :  { %v94_v11 = vmul.f32 0.5, %v90_v10 }
  0xcb   :  { %v217_v12 = vpop.f32.mrf.mxu0 }
  0xcc   :  { %232 = vtanh.f32 %v94_v11 }
  0xd9   :  { %v233_v13 = vpop.eup %232 }
  0xda   :  { %v96_v14 = vmul.f32 0.5, %v233_v13 }
  0xdc   :  { %v97_v15 = vadd.f32 0.5, %v96_v14 }
  0xde   :  { %227 = vmatmul.mubr.msk.f32.vlgmr.msra.gmra.mxu1 %vm20_vm1, %v97_v15 }
 0x19e   :  { %v171_v16 = vpop.f32.mrf.mxu1 }
 0x19f   :  { %v175_v17 = vmul.f32 0.5, %v171_v16 }
 0x1a0   :  { %v228_v18 = vpop.f32.mrf.mxu1 }
 0x1a1   :  { %234 = vtanh.f32 %v175_v17 }
 0x1ae   :  { %v235_v19 = vpop.eup %234 }
 0x1af   :  { %v177_v20 = vmul.f32 0.5, %v235_v19 }
 0x1b1   :  { %v178_v21 = vadd.f32 0.5, %v177_v20 }
 0x1b3   :  { %180 = vst.msk [vmem:[#allocation2] sm:$0xff] %vm179_vm2, %v178_v21 }
 0x1b4   :  { %247 = shalt.err (!%p244_p4)
}
 0x1b5   :  { %190 = dma.vmem_to_hbm [thread:$0]  %s188_s29, 128, %s316_s3, [#allocation3]  }
 0x1b6   :  { %256 = dma.done.wait [#allocation3], 128  }
 0x1b7   :  { %257 = vsyncadd [#allocation3], 4294967168 }
 0x1b8   :  { %194 = vsyncpa [#allocation3], 1 }

</bundles_post_ra>
